<compile_context>
chip_gen: v6e
topology: v6e:2x2x1
jax: 0.10.0
libtpu: 0.0.40
codegen_flags: <defaults>
</compile_context>

<pallas_src>
import functools
from typing import NamedTuple

import jax
import jax.numpy as jnp
from jax.experimental import pallas as pl
from jax.experimental.pallas import tpu as pltpu


def _round_up(x, m):
    return (x + m - 1) // m * m


def _vmem_capacity_bytes():
    """Per-core VMEM capacity; conservative (v7x = 64 MiB/TC) if unknown."""
    try:
        info = pltpu.get_tpu_info()
        cap = int(getattr(info, "vmem_capacity_bytes", 0))
        if cap > 0:
            return cap
    except Exception:
        pass
    return 64 * 1024 * 1024


class MLPPlan(NamedTuple):
    mode: str               # "resident" (weights VMEM-resident) or "ktiled"
    tm: int                 # max row-tile size (clamped to M at call time)
    th: int                 # hidden-chunk size (== h_pad in resident mode)
    h_pad: int              # padded hidden size
    vmem_limit_bytes: int
    gelu_approx: bool


def make_mlp_plan(in_features, hidden_features, out_features,
                  out_dtype=jnp.float32, *, tm=None, th=1024,
                  vmem_limit_bytes=None, force_ktiled=False,
                  gelu_approx=True, mm_dtype=jnp.bfloat16):
    """Choose tiling/VMEM budget once, from static shapes + chip VMEM size."""
    D_in, H, D_out = in_features, hidden_features, out_features
    mm = jnp.dtype(mm_dtype).itemsize
    osz = jnp.dtype(out_dtype).itemsize

    if vmem_limit_bytes is None:
        cap = _vmem_capacity_bytes()
        # ~96 MiB on 128 MiB parts (v5e/v6e), ~48 MiB on 64 MiB/TC (v7x).
        vmem_limit_bytes = min(cap * 3 // 4, 100 * 1024 * 1024)

    if tm is None:
        # Bigger row tiles when VMEM allows: keeps weight traffic amortized.
        tm = 1024 if vmem_limit_bytes >= 80 * 1024 * 1024 else 512

    def resident_bytes(tm_):
        w = 2 * mm * (D_in * H + H * D_out)               # double-buffered weights
        xio = 2 * mm * tm_ * D_in + 2 * osz * tm_ * D_out  # x / out tiles (2-buffered)
        interm = tm_ * H * (4 + mm) + 4 * tm_ * D_out      # h(f32) + g(bf16) + y(f32)
        bias = 2 * 4 * (H + D_out)
        return w + xio + interm + bias

    def ktiled_bytes(tm_, th_):
        w = 2 * mm * (D_in * th_ + th_ * D_out)
        xio = 2 * mm * tm_ * D_in + 2 * osz * tm_ * D_out
        interm = tm_ * th_ * (4 + mm)
        acc = 4 * tm_ * D_out
        bias = 2 * 4 * (th_ + D_out)
        return w + xio + interm + acc + bias

    if not force_ktiled:
        tm_try = tm
        while tm_try >= 256:
            if resident_bytes(tm_try) <= vmem_limit_bytes:
                return MLPPlan("resident", tm_try, H, H, vmem_limit_bytes,
                               gelu_approx)
            tm_try //= 2

    # Fallback: chunk the hidden dim, accumulate fc2 partials in f32 VMEM.
    tm_try = tm
    while tm_try >= 256:
        th_try = _round_up(min(th, H), 256)
        while th_try >= 256:
            if ktiled_bytes(tm_try, th_try) <= vmem_limit_bytes:
                return MLPPlan("ktiled", tm_try, th_try,
                               _round_up(H, th_try), vmem_limit_bytes,
                               gelu_approx)
            th_try //= 2
        tm_try //= 2
    return MLPPlan("ktiled", 256, 256, _round_up(H, 256), vmem_limit_bytes,
                   gelu_approx)


def prepare_mlp_params(plan, w1_t, b1, w2_t, b2, mm_dtype=jnp.bfloat16):
    """One-time weight prep (pad + bf16 cast) hoisted out of the per-call path.

    w1_t: (D_in, H); b1: (H,); w2_t: (H, D_out); b2: (D_out,).
    Zero-padded hidden units are sound: gelu(0 + 0) = 0 and the padded W2 rows
    are zero, so they contribute nothing to the output.
    """
    H = w1_t.shape[1]
    if plan.h_pad != H:
        w1_t = jnp.pad(w1_t, ((0, 0), (0, plan.h_pad - H)))
        b1 = jnp.pad(b1, (0, plan.h_pad - H))
        w2_t = jnp.pad(w2_t, ((0, plan.h_pad - H), (0, 0)))
    w1_mm = w1_t.astype(mm_dtype)
    w2_mm = w2_t.astype(mm_dtype)
    b1_2d = b1.reshape(1, plan.h_pad).astype(jnp.float32)
    b2_2d = b2.reshape(1, -1).astype(jnp.float32)
    return w1_mm, b1_2d, w2_mm, b2_2d


# ----------------------------------------------------------------------------
# Kernels
# ----------------------------------------------------------------------------

def _mlp_kernel_resident(x_ref, w1_ref, b1_ref, w2_ref, b2_ref, o_ref, *,
                         approx):
    """Whole MLP for one row tile; W1/W2 stay VMEM-resident across the grid."""
    h = jnp.dot(x_ref[...], w1_ref[...], preferred_element_type=jnp.float32)
    h = h + b1_ref[...]
    g = jax.nn.gelu(h, approximate=approx)
    # dropout(p=0.0) is the identity (eval mode) — nothing to do.
    y = jnp.dot(g.astype(w2_ref.dtype), w2_ref[...],
                preferred_element_type=jnp.float32)
    o_ref[...] = (y + b2_ref[...]).astype(o_ref.dtype)


def _mlp_kernel_ktiled(x_ref, w1_ref, b1_ref, w2_ref, b2_ref, o_ref, acc_ref,
                       *, approx):
    """One (row-tile, hidden-chunk) step; fc2 partials accumulate in f32 VMEM."""
    k = pl.program_id(1)

    @pl.when(k == 0)
    def _():
        acc_ref[...] = jnp.zeros_like(acc_ref)

    h = jnp.dot(x_ref[...], w1_ref[...], preferred_element_type=jnp.float32)
    h = h + b1_ref[...]
    g = jax.nn.gelu(h, approximate=approx)   # elementwise over H => exact per chunk
    acc_ref[...] += jnp.dot(g.astype(w2_ref.dtype), w2_ref[...],
                            preferred_element_type=jnp.float32)

    @pl.when(k == pl.num_programs(1) - 1)
    def _():
        o_ref[...] = (acc_ref[...] + b2_ref[...]).astype(o_ref.dtype)


# ----------------------------------------------------------------------------
# Wrapper
# ----------------------------------------------------------------------------

@functools.partial(jax.jit, static_argnames=("plan",))
def mlp_pallas(x, w1_mm, b1_2d, w2_mm, b2_2d, *, plan):
    """x: (B, S, D_in); prepared params from prepare_mlp_params(plan, ...)."""
    B, S, D_in = x.shape
    H_pad = w1_mm.shape[1]
    D_out = w2_mm.shape[1]
    M = B * S
    out_dtype = x.dtype
    mm_dtype = w1_mm.dtype

    tm_eff = min(plan.tm, _round_up(M, 8))
    M_pad = _round_up(M, tm_eff)
    n_row_tiles = M_pad // tm_eff

    x2d = x.reshape(M, D_in).astype(mm_dtype)
    if M_pad != M:
        x2d = jnp.pad(x2d, ((0, M_pad - M), (0, 0)))

    flops = 2 * M_pad * (D_in * H_pad + H_pad * D_out)
    out_bytes = M_pad * D_out * jnp.dtype(out_dtype).itemsize
    x_bytes = x2d.size * x2d.dtype.itemsize
    w_bytes = (w1_mm.size + w2_mm.size) * w1_mm.dtype.itemsize
    b_bytes = (b1_2d.size + b2_2d.size) * 4

    if plan.mode == "resident":
        # Weight block indices are constant across the row axis -> DMA'd once.
        grid = (n_row_tiles,)
        cost = pl.CostEstimate(
            flops=flops, transcendentals=M_pad * H_pad,
            bytes_accessed=x_bytes + w_bytes + b_bytes + out_bytes)
        out2d = pl.pallas_call(
            functools.partial(_mlp_kernel_resident, approx=plan.gelu_approx),
            out_shape=jax.ShapeDtypeStruct((M_pad, D_out), out_dtype),
            grid_spec=pltpu.PrefetchScalarGridSpec(
                num_scalar_prefetch=0,
                grid=grid,
                in_specs=[
                    pl.BlockSpec((tm_eff, D_in), lambda i: (i, 0)),   # x row tile
                    pl.BlockSpec((D_in, H_pad), lambda i: (0, 0)),    # W1 (resident)
                    pl.BlockSpec((1, H_pad), lambda i: (0, 0)),       # b1
                    pl.BlockSpec((H_pad, D_out), lambda i: (0, 0)),   # W2 (resident)
                    pl.BlockSpec((1, D_out), lambda i: (0, 0)),       # b2
                ],
                out_specs=pl.BlockSpec((tm_eff, D_out), lambda i: (i, 0)),
            ),
            compiler_params=pltpu.CompilerParams(
                dimension_semantics=("parallel",),
                vmem_limit_bytes=plan.vmem_limit_bytes,
            ),
            cost_estimate=cost,
        )(x2d, w1_mm, b1_2d, w2_mm, b2_2d)
    else:
        th = plan.th
        n_k = H_pad // th
        grid = (n_row_tiles, n_k)
        # Weights are re-streamed once per row tile in this mode.
        cost = pl.CostEstimate(
            flops=flops, transcendentals=M_pad * H_pad,
            bytes_accessed=x_bytes + n_row_tiles * (w_bytes + b_bytes) + out_bytes)
        out2d = pl.pallas_call(
            functools.partial(_mlp_kernel_ktiled, approx=plan.gelu_approx),
            out_shape=jax.ShapeDtypeStruct((M_pad, D_out), out_dtype),
            grid_spec=pltpu.PrefetchScalarGridSpec(
                num_scalar_prefetch=0,
                grid=grid,
                in_specs=[
                    pl.BlockSpec((tm_eff, D_in), lambda i, k: (i, 0)),  # x row tile
                    pl.BlockSpec((D_in, th), lambda i, k: (0, k)),      # W1 H-chunk
                    pl.BlockSpec((1, th), lambda i, k: (0, k)),         # b1 H-chunk
                    pl.BlockSpec((th, D_out), lambda i, k: (k, 0)),     # W2 H-chunk
                    pl.BlockSpec((1, D_out), lambda i, k: (0, 0)),      # b2
                ],
                out_specs=pl.BlockSpec((tm_eff, D_out), lambda i, k: (i, 0)),
                scratch_shapes=[pltpu.VMEM((tm_eff, D_out), jnp.float32)],
            ),
            compiler_params=pltpu.CompilerParams(
                dimension_semantics=("parallel", "arbitrary"),
                vmem_limit_bytes=plan.vmem_limit_bytes,
            ),
            cost_estimate=cost,
        )(x2d, w1_mm, b1_2d, w2_mm, b2_2d)

    return out2d[:M].reshape(B, S, D_out)


# ----------------------------------------------------------------------------
# Reference / init (mirrors the PyTorch module)
# ----------------------------------------------------------------------------

def init_mlp_params(key, in_features, hidden_features, out_features,
                    dtype=jnp.float32):
    """Deterministic init mirroring the PyTorch module's _init_weights()."""
    k1, k2, k3, k4 = jax.random.split(key, 4)
    std1 = (2.0 / (in_features + hidden_features)) ** 0.5   # xavier_normal_
    std2 = (2.0 / (hidden_features + out_features)) ** 0.5
    w1 = jax.random.normal(k1, (hidden_features, in_features), dtype) * std1
    b1 = jax.random.normal(k2, (hidden_features,), dtype) * 1e-6
    w2 = jax.random.normal(k3, (out_features, hidden_features), dtype) * std2
    b2 = jax.random.normal(k4, (out_features,), dtype) * 1e-6
    # pre-transpose to (in, out) for the kernel's row-major matmul
    return w1.T, b1, w2.T, b2


def mlp_reference(x, w1_t, b1, w2_t, b2):
    h = jax.nn.gelu(x @ w1_t + b1, approximate=False)   # torch-exact erf GELU
    return h @ w2_t + b2


if __name__ == "__main__":
    key = jax.random.PRNGKey(0)
    kx, kp = jax.random.split(key)

    # Small config consistent with a ViT MLP block.
    batch, seq = 2, 8
    in_features, hidden_features, out_features = 32, 64, 32

    x = jax.random.normal(kx, (batch, seq, in_features), jnp.float32)
    w1_t, b1, w2_t, b2 = init_mlp_params(kp, in_features, hidden_features,
                                         out_features)

    # Path 1: weights-resident fast path (single "parallel" row axis).
    plan = make_mlp_plan(in_features, hidden_features, out_features, x.dtype)
    params = prepare_mlp_params(plan, w1_t, b1, w2_t, b2)
    y = jax.block_until_ready(mlp_pallas(x, *params, plan=plan))
    y_ref = mlp_reference(x, w1_t, b1, w2_t, b2)
    assert y.shape == (batch, seq, out_features)
    # bf16 MXU inputs + tanh-approx GELU vs f32 erf reference -> relaxed tol.
    assert jnp.allclose(y, y_ref, atol=3e-2, rtol=3e-2)

    # Path 2: hidden-chunked (k-tiled) fallback, forced to exercise that code.
    in2, hid2, out2 = 128, 512, 128
    x2 = jax.random.normal(kx, (batch, seq, in2), jnp.float32)
    p2 = init_mlp_params(kp, in2, hid2, out2)
    plan2 = make_mlp_plan(in2, hid2, out2, x2.dtype, th=256, force_ktiled=True)
    params2 = prepare_mlp_params(plan2, *p2)
    y2 = jax.block_until_ready(mlp_pallas(x2, *params2, plan=plan2))
    y2_ref = mlp_reference(x2, *p2)
    assert y2.shape == (batch, seq, out2)
    assert jnp.allclose(y2, y2_ref, atol=3e-2, rtol=3e-2)

    print("KERNEL_OK")
</pallas_src>

<mosaic_0001>
module attributes {stable_mosaic.version = 11 : i64} {
  func.func @_mlp_kernel_resident(%arg0: i32, %arg1: memref<16x32xbf16, #tpu.memory_space<vmem>>, %arg2: memref<32x64xbf16, #tpu.memory_space<vmem>>, %arg3: memref<1x64xf32, #tpu.memory_space<vmem>>, %arg4: memref<64x32xbf16, #tpu.memory_space<vmem>>, %arg5: memref<1x32xf32, #tpu.memory_space<vmem>>, %arg6: memref<16x32xf32, #tpu.memory_space<vmem>>) attributes {dimension_semantics = [#tpu.dimension_semantics<parallel>], iteration_bounds = array<i64: 1>, scalar_prefetch = 0 : i64, scratch_operands = 0 : i64, tpu.core_type = #tpu.core_type<tc>, window_params = [{transform_indices = @transform_0, window_bounds = array<i64: 16, 32>}, {pipeline_mode = #tpu.pipeline_mode<synchronous>, transform_indices = @transform_1, window_bounds = array<i64: 32, 64>}, {pipeline_mode = #tpu.pipeline_mode<synchronous>, transform_indices = @transform_2, window_bounds = array<i64: 1, 64>}, {pipeline_mode = #tpu.pipeline_mode<synchronous>, transform_indices = @transform_3, window_bounds = array<i64: 64, 32>}, {pipeline_mode = #tpu.pipeline_mode<synchronous>, transform_indices = @transform_4, window_bounds = array<i64: 1, 32>}, {transform_indices = @transform_5, window_bounds = array<i64: 16, 32>}]} {
    %c0 = arith.constant 0 : index
    %c0_0 = arith.constant 0 : index
    %0 = vector.load %arg1[%c0, %c0_0] : memref<16x32xbf16, #tpu.memory_space<vmem>>, vector<16x32xbf16>
    %c0_1 = arith.constant 0 : index
    %c0_2 = arith.constant 0 : index
    %1 = vector.load %arg2[%c0_1, %c0_2] : memref<32x64xbf16, #tpu.memory_space<vmem>>, vector<32x64xbf16>
    %cst = arith.constant dense<0.000000e+00> : vector<16x64xf32>
    %2 = tpu.matmul %0, %1, %cst {dimension_numbers = #tpu.dot_dimension_numbers<[1], [0], [0], [1], [0, 0, 1, 1], [], []>} : vector<16x32xbf16>, vector<32x64xbf16>, vector<16x64xf32> -> vector<16x64xf32>
    %c0_3 = arith.constant 0 : index
    %c0_4 = arith.constant 0 : index
    %3 = vector.load %arg3[%c0_3, %c0_4] : memref<1x64xf32, #tpu.memory_space<vmem>>, vector<1x64xf32>
    %4 = vector.broadcast %3 : vector<1x64xf32> to vector<16x64xf32>
    %5 = arith.addf %2, %4 : vector<16x64xf32>
    %6 = arith.mulf %5, %5 : vector<16x64xf32>
    %7 = arith.mulf %5, %6 : vector<16x64xf32>
    %cst_5 = arith.constant 4.471500e-02 : f32
    %8 = vector.broadcast %cst_5 : f32 to vector<16x64xf32>
    %9 = arith.mulf %8, %7 : vector<16x64xf32>
    %10 = arith.addf %5, %9 : vector<16x64xf32>
    %cst_6 = arith.constant 0.797884583 : f32
    %11 = vector.broadcast %cst_6 : f32 to vector<16x64xf32>
    %12 = arith.mulf %11, %10 : vector<16x64xf32>
    %13 = math.tanh %12 : vector<16x64xf32>
    %cst_7 = arith.constant 1.000000e+00 : f32
    %14 = vector.broadcast %cst_7 : f32 to vector<16x64xf32>
    %15 = arith.addf %14, %13 : vector<16x64xf32>
    %cst_8 = arith.constant 5.000000e-01 : f32
    %16 = vector.broadcast %cst_8 : f32 to vector<16x64xf32>
    %17 = arith.mulf %16, %15 : vector<16x64xf32>
    %18 = arith.mulf %5, %17 : vector<16x64xf32>
    %19 = arith.truncf %18 : vector<16x64xf32> to vector<16x64xbf16>
    %c0_9 = arith.constant 0 : index
    %c0_10 = arith.constant 0 : index
    %20 = vector.load %arg4[%c0_9, %c0_10] : memref<64x32xbf16, #tpu.memory_space<vmem>>, vector<64x32xbf16>
    %cst_11 = arith.constant dense<0.000000e+00> : vector<16x32xf32>
    %21 = tpu.matmul %19, %20, %cst_11 {dimension_numbers = #tpu.dot_dimension_numbers<[1], [0], [0], [1], [0, 0, 1, 1], [], []>} : vector<16x64xbf16>, vector<64x32xbf16>, vector<16x32xf32> -> vector<16x32xf32>
    %c0_12 = arith.constant 0 : index
    %c0_13 = arith.constant 0 : index
    %22 = vector.load %arg5[%c0_12, %c0_13] : memref<1x32xf32, #tpu.memory_space<vmem>>, vector<1x32xf32>
    %23 = vector.broadcast %22 : vector<1x32xf32> to vector<16x32xf32>
    %24 = arith.addf %21, %23 : vector<16x32xf32>
    %c0_14 = arith.constant 0 : index
    %c0_15 = arith.constant 0 : index
    %25 = vector.load %arg6[%c0_14, %c0_15] : memref<16x32xf32, #tpu.memory_space<vmem>>, vector<16x32xf32>
    tpu.vector_store %arg6[%c0_14, %c0_15], %24 {strides = array<i32>} : memref<16x32xf32, #tpu.memory_space<vmem>>, vector<16x32xf32>,
    return
  }
  func.func @transform_0(%arg0: i32) -> (i32, i32) {
    %c0_i32 = arith.constant 0 : i32
    %c0_i32_0 = arith.constant 0 : i32
    return %arg0, %c0_i32 : i32, i32
  }
  func.func @transform_1(%arg0: i32) -> (i32, i32) {
    %c0_i32 = arith.constant 0 : i32
    %c0_i32_0 = arith.constant 0 : i32
    %c0_i32_1 = arith.constant 0 : i32
    return %c0_i32, %c0_i32_0 : i32, i32
  }
  func.func @transform_2(%arg0: i32) -> (i32, i32) {
    %c0_i32 = arith.constant 0 : i32
    %c0_i32_0 = arith.constant 0 : i32
    %c0_i32_1 = arith.constant 0 : i32
    return %c0_i32, %c0_i32_0 : i32, i32
  }
  func.func @transform_3(%arg0: i32) -> (i32, i32) {
    %c0_i32 = arith.constant 0 : i32
    %c0_i32_0 = arith.constant 0 : i32
    %c0_i32_1 = arith.constant 0 : i32
    return %c0_i32, %c0_i32_0 : i32, i32
  }
  func.func @transform_4(%arg0: i32) -> (i32, i32) {
    %c0_i32 = arith.constant 0 : i32
    %c0_i32_0 = arith.constant 0 : i32
    %c0_i32_1 = arith.constant 0 : i32
    return %c0_i32, %c0_i32_0 : i32, i32
  }
  func.func @transform_5(%arg0: i32) -> (i32, i32) {
    %c0_i32 = arith.constant 0 : i32
    %c0_i32_0 = arith.constant 0 : i32
    return %arg0, %c0_i32 : i32, i32
  }
}

</mosaic_0001>

<bundles_post_ra>
// kernel: mlp_pallas.1
= control target key start
LH: loop header
LB: loop body
LE: loop exit
PB: predicated region body
PF: predicated region fallthrough
CT: control target
= control target key end

     0   :  { %v295_v1 = vmov 0.0   ;;  %vm296_vm0 = vmmov 0   ;;  %vm52_vm1 = vcmask 261120   ;;  %s363_s0 = inlined_call_operand.vmem [shape: bf16[16,32], index: 0, kind: input, shape index: {}]   ;;  %s364_s1 = inlined_call_operand.vmem [shape: bf16[32,64], index: 1, kind: input, shape index: {}]   ;;  %s365_s2 = inlined_call_operand.vmem [shape: f32[1,64], index: 2, kind: input, shape index: {}]   ;;  %s366_s3 = inlined_call_operand.vmem [shape: bf16[64,32], index: 3, kind: input, shape index: {}]   ;;  %s367_s4 = inlined_call_operand.vmem [shape: f32[1,32], index: 4, kind: input, shape index: {}]   ;;  %s368_s5 = inlined_call_operand.hbm [shape: f32[16,32], index: 5, kind: output, shape index: {}]  }
   0x1   :  { %v262_v0 = vld [vmem:[%s364_s1 + $0x8] sm:$0xff]   ;;  %237 = vmatprep.subr.bf16.mxu0 %v295_v1  ;;  %245 = vmatprep.subr.bf16.mxu1 %v295_v1  ;;  %v263_v2 = vld [vmem:[%s364_s1] sm:$0xff]  }
   0x2   :  { %238 = vmatpush3.bf16.msra.mxu0 %v262_v0  ;;  %241 = vmatprep.mubr.msk.bf16.mxu0 %vm296_vm0, %v295_v1  ;;  %v264_v3 = vld [vmem:[%s363_s0] sm:$0xff]  }
   0x3   :  { %239 = vmatprep.subr.bf16.mxu0 %v295_v1  ;;  %253 = vmatprep.mubr.msk.bf16.mxu1 %vm296_vm0, %v295_v1 }
   0x6   :  { %240 = vmatpush3.bf16.msra.mxu0 %v263_v2 }
   0x7   :  { %10 = vsyncpa [#allocation3], 0  ;;  %v265_v4 = vld [vmem:[%s366_s3 + $0x18] sm:$0xff]   ;;  %v266_v5 = vld [vmem:[%s366_s3 + $0x10] sm:$0xff]   ;;  %vm155_vm2 = vcmask 523264   ;;  %s297_s7 = smov [#allocation2]  }
   0x8   :  { %246 = vmatpush3.bf16.msra.mxu1 %v265_v4  ;;  %v267_v6 = vld [vmem:[%s366_s3 + $0x8] sm:$0xff]   ;;  %v268_v7 = vld [vmem:[%s366_s3] sm:$0xff]   ;;  %s207_s8 = sshll.u32 %s297_s7, 4  ;;  %s208_s8 = int_to_ptr.vmem [resolvable:$true] %s207_s8 }
   0x9   :  { %242 = vmatmul.mubr.msk.bf16.vlgmr.msra.gmra.mxu0 %vm52_vm1, %v264_v3  ;;  %247 = vmatprep.subr.bf16.mxu1 %v295_v1  ;;  %v218_v8 = vld [vmem:[%s365_s2] ss:$0 sm:$0xff]  ;;  %s273_s9 = scalar_lea.vmem %s208_s8, 256  ;;  %p278_p1 = scmp.lt.s32.totalorder %s208_s8, %s208_s8 }
   0xa   :  { %v223_v34 = vld [vmem:[%s367_s4] ss:$0 sm:$0xff]  ;;  %p274_p0 = scmp.ne.s32.totalorder %s208_s8, %s273_s9  ;;  %p279_p2 = scmp.lt.s32.totalorder %s273_s9, %s273_s9 }
   0xc   :  { %248 = vmatpush3.bf16.msra.mxu1 %v266_v5  ;;  %p280_p3 = por %p279_p2, %p278_p1 }
   0xd   :  { %249 = vmatprep.subr.bf16.mxu1 %v295_v1 }
   0xe   :  { %p281_p4 = pnand %p280_p3, %p274_p0 }
  0x10   :  { %250 = vmatpush3.bf16.msra.mxu1 %v267_v6 }
  0x11   :  { %251 = vmatprep.subr.bf16.mxu1 %v295_v1 }
  0x14   :  { %252 = vmatpush3.bf16.msra.mxu1 %v268_v7 }
  0xc9   :  { %v90_v9 = vpop.f32.mrf.mxu0 }
  0xca   :  { %v91_v10 = vadd.f32 %v218_v8, %v90_v9 }
  0xcb   :  { %v243_v11 = vpop.f32.mrf.mxu0 }
  0xcc   :  { %v97_v12 = vmul.f32 %v91_v10, %v91_v10 }
  0xcd   :  { %v93_v13 = vpop.f32.mrf.mxu0 }
  0xce   :  { %v99_v14 = vmul.f32 %v97_v12, %v91_v10  ;;  %v94_v15 = vadd.f32 %v218_v8, %v93_v13 }
  0xcf   :  { %v244_v16 = vpop.f32.mrf.mxu0 }
  0xd0   :  { %v101_v17 = vmul.f32 0.044715, %v99_v14  ;;  %v98_v18 = vmul.f32 %v94_v15, %v94_v15 }
  0xd2   :  { %v103_v19 = vadd.f32 %v101_v17, %v91_v10  ;;  %v100_v20 = vmul.f32 %v98_v18, %v94_v15 }
  0xd4   :  { %v105_v21 = vmul.f32 0.7978846, %v103_v19  ;;  %v102_v22 = vmul.f32 0.044715, %v100_v20 }
  0xd6   :  { %269 = vtanh.f32 %v105_v21  ;;  %v104_v23 = vadd.f32 %v102_v22, %v94_v15 }
  0xd8   :  { %v106_v24 = vmul.f32 0.7978846, %v104_v23 }
  0xda   :  { %271 = vtanh.f32 %v106_v24 }
  0xe3   :  { %v270_v25 = vpop.eup %269 }
  0xe4   :  { %v109_v26 = vadd.f32 1.0, %v270_v25 }
  0xe6   :  { %v111_v28 = vmul.f32 0.5, %v109_v26 }
  0xe7   :  { %v272_v27 = vpop.eup %271 }
  0xe8   :  { %v110_v29 = vadd.f32 1.0, %v272_v27  ;;  %v113_v31 = vmul.f32 %v111_v28, %v91_v10 }
  0xea   :  { %v112_v30 = vmul.f32 0.5, %v110_v29 }
  0xec   :  { %v114_v32 = vmul.f32 %v112_v30, %v94_v15 }
  0xee   :  { %v115_v33 = vpack.c.bf16 %v114_v32, %v113_v31 }
  0xf0   :  { %254 = vmatmul.mubr.msk.bf16.vlgmr.msra.gmra.mxu1 %vm155_vm2, %v115_v33 }
 0x1b0   :  { %v193_v35 = vpop.f32.mrf.mxu1 }
 0x1b1   :  { %v194_v36 = vadd.f32 %v223_v34, %v193_v35 }
 0x1b2   :  { %v255_v37 = vpop.f32.mrf.mxu1 }
 0x1b3   :  { %200 = vst.msk [vmem:[#allocation2] sm:$0xff] %vm52_vm1, %v194_v36 }
 0x1b4   :  { %v196_v38 = vpop.f32.mrf.mxu1 }
 0x1b5   :  { %v197_v39 = vadd.f32 %v223_v34, %v196_v38 }
 0x1b6   :  { %v256_v40 = vpop.f32.mrf.mxu1 }
 0x1b7   :  { %201 = vst.msk [vmem:[#allocation2 + $0x8] sm:$0xff] %vm52_vm1, %v197_v39 }
 0x1b8   :  { %284 = shalt.err (!%p281_p4)
}
 0x1b9   :  { %s298_s4 = smov 128   ;;  %s299_s10 = smov 8  }
 0x1ba   :  { %213 = dma.vmem_to_hbm [thread:$0]  %s208_s8, 256, %s368_s5, [#allocation3], %s298_s4, %s298_s4, %s299_s10  }
 0x1bb   :  { %293 = dma.done.wait [#allocation3], 256  }
 0x1bc   :  { %294 = vsyncadd [#allocation3], 4294967040 }
 0x1bd   :  { %217 = vsyncpa [#allocation3], 1 }

</bundles_post_ra>
